<compile_context>
chip_gen: v5e
topology: v5e:2x2
jax: 0.10.0
libtpu: 0.0.40
codegen_flags: <defaults>
</compile_context>

<pallas_src>
import functools

import jax
import jax.numpy as jnp
from jax.experimental import pallas as pl
from jax.experimental.pallas import tpu as pltpu

HIDDEN_DIM = 10
BN_EPS = 1e-5


# ---------------------------------------------------------------------------
# Kernels (all activations are (features, batch_tile) = sublanes x lanes)
# ---------------------------------------------------------------------------
def _masked(h, n_valid, block_n):
    """Zero out padded batch columns (static no-op when batch % block == 0)."""
    if n_valid % block_n == 0:
        return h
    col = (jax.lax.broadcasted_iota(jnp.int32, h.shape, 1)
           + pl.program_id(0) * block_n)
    return jnp.where(col < n_valid, h, 0.0)


def _stage1_kernel(x_ref, w1_ref, b1_ref,
                   h1_ref, sum_ref, sumsq_ref,
                   *, n_valid, block_n):
    # x: (2, bn), w1: (H, 2), b1: (H, 1)
    @pl.when(pl.program_id(0) == 0)
    def _():
        sum_ref[...] = jnp.zeros_like(sum_ref)
        sumsq_ref[...] = jnp.zeros_like(sumsq_ref)

    x = x_ref[...]
    w1 = w1_ref[...]
    # Linear(2, H) as 2 VPU broadcast MACs: (H,1)*(1,bn) -> (H,bn)
    h1 = w1[:, 0:1] * x[0:1, :] + w1[:, 1:2] * x[1:2, :] + b1_ref[...]
    h1_ref[...] = h1

    hm = _masked(h1, n_valid, block_n)
    sum_ref[...] += jnp.sum(hm, axis=1, keepdims=True)
    sumsq_ref[...] += jnp.sum(hm * hm, axis=1, keepdims=True)


def _stage2_kernel(h1_ref, s1_ref, t1_ref, w2_ref, b2_ref,
                   h2_ref, sum_ref, sumsq_ref,
                   *, n_valid, block_n, hidden):
    @pl.when(pl.program_id(0) == 0)
    def _():
        sum_ref[...] = jnp.zeros_like(sum_ref)
        sumsq_ref[...] = jnp.zeros_like(sumsq_ref)

    # Folded BN1 + ReLU
    a1 = jnp.maximum(h1_ref[...] * s1_ref[...] + t1_ref[...], 0.0)  # (H, bn)
    w2 = w2_ref[...]                                                # (H, H)
    # Linear(H, H) as H unrolled VPU broadcast MACs
    h2 = b2_ref[...] + w2[:, 0:1] * a1[0:1, :]
    for k in range(1, hidden):
        h2 = h2 + w2[:, k:k + 1] * a1[k:k + 1, :]
    h2_ref[...] = h2

    hm = _masked(h2, n_valid, block_n)
    sum_ref[...] += jnp.sum(hm, axis=1, keepdims=True)
    sumsq_ref[...] += jnp.sum(hm * hm, axis=1, keepdims=True)


def _stage3_kernel(h2_ref, s2_ref, t2_ref, w3_ref, b3_ref, o_ref,
                   *, hidden):
    # Folded BN2 + ReLU
    a2 = jnp.maximum(h2_ref[...] * s2_ref[...] + t2_ref[...], 0.0)  # (H, bn)
    w3 = w3_ref[...]                                                # (1, H)
    # Linear(H, 1) as H unrolled VPU broadcast MACs -> lane-dense (1, bn) store
    o = b3_ref[...] + w3[:, 0:1] * a2[0:1, :]
    for k in range(1, hidden):
        o = o + w3[:, k:k + 1] * a2[k:k + 1, :]
    o_ref[...] = o


# ---------------------------------------------------------------------------
# Wrapper
# ---------------------------------------------------------------------------
def phi_forward(x, params, *, tile_n=2048):
    """x: (N, 2) float32.  Returns (N, 1) float32 (PyTorch layout)."""
    n = x.shape[0]
    h = params["w1"].shape[0]

    # Lane-aligned batch tile (multiple of 128), as large as requested / needed.
    n_pad128 = ((n + 127) // 128) * 128
    block = max(128, (min(tile_n, n_pad128) // 128) * 128)
    n_pad = ((n + block - 1) // block) * block
    grid = (n_pad // block,)

    # Transpose to lane-dense (features, batch) layout; pad batch to the tile.
    x_t = jnp.pad(x.T.astype(jnp.float32), ((0, 0), (0, n_pad - n)))  # (2, n_pad)

    const = lambda i: (0, 0)
    tiled = lambda i: (0, i)

    # ---- Stage 1: Linear(2,H) + BN1 statistics ----
    h1, sum1, sumsq1 = pl.pallas_call(
        functools.partial(_stage1_kernel, n_valid=n, block_n=block),
        grid=grid,
        in_specs=[
            pl.BlockSpec((2, block), tiled),
            pl.BlockSpec((h, 2), const),
            pl.BlockSpec((h, 1), const),
        ],
        out_specs=[
            pl.BlockSpec((h, block), tiled),
            pl.BlockSpec((h, 1), const),
            pl.BlockSpec((h, 1), const),
        ],
        out_shape=[
            jax.ShapeDtypeStruct((h, n_pad), jnp.float32),
            jax.ShapeDtypeStruct((h, 1), jnp.float32),
            jax.ShapeDtypeStruct((h, 1), jnp.float32),
        ],
        compiler_params=pltpu.CompilerParams(dimension_semantics=("arbitrary",)),
    )(x_t, params["w1"], params["b1"])

    # Fold BN1 into a single scale/shift (tiny (H,1) math in plain JAX).
    mean1 = sum1 / n
    var1 = jnp.maximum(sumsq1 / n - mean1 * mean1, 0.0)
    s1 = params["g1"] * jax.lax.rsqrt(var1 + BN_EPS)
    t1 = params["beta1"] - mean1 * s1

    # ---- Stage 2: BN1+ReLU, Linear(H,H) + BN2 statistics ----
    h2, sum2, sumsq2 = pl.pallas_call(
        functools.partial(_stage2_kernel, n_valid=n, block_n=block, hidden=h),
        grid=grid,
        in_specs=[
            pl.BlockSpec((h, block), tiled),
            pl.BlockSpec((h, 1), const),
            pl.BlockSpec((h, 1), const),
            pl.BlockSpec((h, h), const),
            pl.BlockSpec((h, 1), const),
        ],
        out_specs=[
            pl.BlockSpec((h, block), tiled),
            pl.BlockSpec((h, 1), const),
            pl.BlockSpec((h, 1), const),
        ],
        out_shape=[
            jax.ShapeDtypeStruct((h, n_pad), jnp.float32),
            jax.ShapeDtypeStruct((h, 1), jnp.float32),
            jax.ShapeDtypeStruct((h, 1), jnp.float32),
        ],
        compiler_params=pltpu.CompilerParams(dimension_semantics=("arbitrary",)),
    )(h1, s1, t1, params["w2"], params["b2"])

    mean2 = sum2 / n
    var2 = jnp.maximum(sumsq2 / n - mean2 * mean2, 0.0)
    s2 = params["g2"] * jax.lax.rsqrt(var2 + BN_EPS)
    t2 = params["beta2"] - mean2 * s2

    # ---- Stage 3: BN2+ReLU, Linear(H,1) ----
    out_t = pl.pallas_call(
        functools.partial(_stage3_kernel, hidden=h),
        grid=grid,
        in_specs=[
            pl.BlockSpec((h, block), tiled),
            pl.BlockSpec((h, 1), const),
            pl.BlockSpec((h, 1), const),
            pl.BlockSpec((1, h), const),
            pl.BlockSpec((1, 1), const),
        ],
        out_specs=pl.BlockSpec((1, block), tiled),
        out_shape=jax.ShapeDtypeStruct((1, n_pad), jnp.float32),
        compiler_params=pltpu.CompilerParams(dimension_semantics=("parallel",)),
    )(h2, s2, t2, params["w3"], params["b3"])

    return out_t[:, :n].T  # back to PyTorch (N, 1)


# ---------------------------------------------------------------------------
# Parameters (PyTorch (out, in) weight layout) and pure-JAX reference
# ---------------------------------------------------------------------------
def init_params(key, hidden_dim=HIDDEN_DIM):
    ks = jax.random.split(key, 6)
    scale = 0.5
    return {
        "w1": scale * jax.random.normal(ks[0], (hidden_dim, 2), jnp.float32),
        "b1": scale * jax.random.normal(ks[1], (hidden_dim, 1), jnp.float32),
        "g1": 1.0 + 0.1 * jax.random.normal(ks[2], (hidden_dim, 1), jnp.float32),
        "beta1": 0.1 * jax.random.normal(ks[3], (hidden_dim, 1), jnp.float32),
        "w2": scale * jax.random.normal(ks[4], (hidden_dim, hidden_dim), jnp.float32),
        "b2": jnp.linspace(-0.1, 0.1, hidden_dim, dtype=jnp.float32)[:, None],
        "g2": jnp.ones((hidden_dim, 1), jnp.float32),
        "beta2": jnp.zeros((hidden_dim, 1), jnp.float32),
        "w3": scale * jax.random.normal(ks[5], (1, hidden_dim), jnp.float32),
        "b3": jnp.full((1, 1), 0.05, jnp.float32),
    }


def phi_reference(x, p):
    """Pure-JAX reference with PyTorch semantics (train-mode BatchNorm1d)."""
    h = x @ p["w1"].T + p["b1"].T
    m = jnp.mean(h, axis=0, keepdims=True)
    v = jnp.mean((h - m) ** 2, axis=0, keepdims=True)
    h = jnp.maximum((h - m) / jnp.sqrt(v + BN_EPS) * p["g1"].T + p["beta1"].T, 0.0)
    h = h @ p["w2"].T + p["b2"].T
    m = jnp.mean(h, axis=0, keepdims=True)
    v = jnp.mean((h - m) ** 2, axis=0, keepdims=True)
    h = jnp.maximum((h - m) / jnp.sqrt(v + BN_EPS) * p["g2"].T + p["beta2"].T, 0.0)
    return h @ p["w3"].T + p["b3"].T


if __name__ == "__main__":
    key = jax.random.PRNGKey(0)
    k_x, k_p = jax.random.split(key)

    batch = 200  # not a multiple of 128: exercises grid (2 tiles) + stat masking
    x = jax.random.normal(k_x, (batch, 2), jnp.float32)
    params = init_params(k_p, HIDDEN_DIM)

    out = jax.block_until_ready(phi_forward(x, params, tile_n=128))
    ref = phi_reference(x, params)

    assert out.shape == (batch, 1), out.shape
    assert jnp.allclose(out, ref, atol=1e-4, rtol=1e-4), (
        float(jnp.max(jnp.abs(out - ref))))

    print("KERNEL_OK")
</pallas_src>

<mosaic_0001>
module attributes {stable_mosaic.version = 11 : i64} {
  func.func @_stage1_kernel(%arg0: i32, %arg1: memref<2x128xf32, #tpu.memory_space<vmem>>, %arg2: memref<10x2xf32, #tpu.memory_space<vmem>>, %arg3: memref<10x1xf32, #tpu.memory_space<vmem>>, %arg4: memref<10x128xf32, #tpu.memory_space<vmem>>, %arg5: memref<10x1xf32, #tpu.memory_space<vmem>>, %arg6: memref<10x1xf32, #tpu.memory_space<vmem>>) attributes {dimension_semantics = [#tpu.dimension_semantics<arbitrary>], iteration_bounds = array<i64: 2>, scalar_prefetch = 0 : i64, scratch_operands = 0 : i64, tpu.core_type = #tpu.core_type<tc>, window_params = [{transform_indices = @transform_0, window_bounds = array<i64: 2, 128>}, {pipeline_mode = #tpu.pipeline_mode<synchronous>, transform_indices = @transform_1, window_bounds = array<i64: 10, 2>}, {pipeline_mode = #tpu.pipeline_mode<synchronous>, transform_indices = @transform_2, window_bounds = array<i64: 10, 1>}, {transform_indices = @transform_3, window_bounds = array<i64: 10, 128>}, {pipeline_mode = #tpu.pipeline_mode<synchronous>, transform_indices = @transform_4, window_bounds = array<i64: 10, 1>}, {pipeline_mode = #tpu.pipeline_mode<synchronous>, transform_indices = @transform_5, window_bounds = array<i64: 10, 1>}]} {
    %c0_i32 = arith.constant 0 : i32
    %0 = arith.cmpi eq, %arg0, %c0_i32 : i32
    %1 = arith.extui %0 : i1 to i32
    %c0_i32_0 = arith.constant 0 : i32
    %2 = arith.cmpi ne, %1, %c0_i32_0 : i32
    scf.if %2 {
      %cst_18 = arith.constant 0.000000e+00 : f32
      %39 = vector.broadcast %cst_18 : f32 to vector<10x1xf32>
      %c0_19 = arith.constant 0 : index
      %c0_20 = arith.constant 0 : index
      %40 = vector.load %arg5[%c0_19, %c0_20] : memref<10x1xf32, #tpu.memory_space<vmem>>, vector<10x1xf32>
      tpu.vector_store %arg5[%c0_19, %c0_20], %39 {strides = array<i32>} : memref<10x1xf32, #tpu.memory_space<vmem>>, vector<10x1xf32>,
      %cst_21 = arith.constant 0.000000e+00 : f32
      %41 = vector.broadcast %cst_21 : f32 to vector<10x1xf32>
      %c0_22 = arith.constant 0 : index
      %c0_23 = arith.constant 0 : index
      %42 = vector.load %arg6[%c0_22, %c0_23] : memref<10x1xf32, #tpu.memory_space<vmem>>, vector<10x1xf32>
      tpu.vector_store %arg6[%c0_22, %c0_23], %41 {strides = array<i32>} : memref<10x1xf32, #tpu.memory_space<vmem>>, vector<10x1xf32>,
    } else {
    }
    %c0 = arith.constant 0 : index
    %c0_1 = arith.constant 0 : index
    %3 = vector.load %arg1[%c0, %c0_1] : memref<2x128xf32, #tpu.memory_space<vmem>>, vector<2x128xf32>
    %c0_2 = arith.constant 0 : index
    %c0_3 = arith.constant 0 : index
    %4 = vector.load %arg2[%c0_2, %c0_3] : memref<10x2xf32, #tpu.memory_space<vmem>>, vector<10x2xf32>
    %5 = vector.extract_strided_slice %4 {offsets = [0, 0], sizes = [10, 1], strides = [1, 1]} : vector<10x2xf32> to vector<10x1xf32>
    %6 = vector.extract_strided_slice %3 {offsets = [0, 0], sizes = [1, 128], strides = [1, 1]} : vector<2x128xf32> to vector<1x128xf32>
    %7 = vector.broadcast %5 : vector<10x1xf32> to vector<10x128xf32>
    %8 = vector.broadcast %6 : vector<1x128xf32> to vector<10x128xf32>
    %9 = arith.mulf %7, %8 : vector<10x128xf32>
    %10 = vector.extract_strided_slice %4 {offsets = [0, 1], sizes = [10, 1], strides = [1, 1]} : vector<10x2xf32> to vector<10x1xf32>
    %11 = vector.extract_strided_slice %3 {offsets = [1, 0], sizes = [1, 128], strides = [1, 1]} : vector<2x128xf32> to vector<1x128xf32>
    %12 = vector.broadcast %10 : vector<10x1xf32> to vector<10x128xf32>
    %13 = vector.broadcast %11 : vector<1x128xf32> to vector<10x128xf32>
    %14 = arith.mulf %12, %13 : vector<10x128xf32>
    %15 = arith.addf %9, %14 : vector<10x128xf32>
    %c0_4 = arith.constant 0 : index
    %c0_5 = arith.constant 0 : index
    %16 = vector.load %arg3[%c0_4, %c0_5] : memref<10x1xf32, #tpu.memory_space<vmem>>, vector<10x1xf32>
    %17 = vector.broadcast %16 : vector<10x1xf32> to vector<10x128xf32>
    %18 = arith.addf %15, %17 : vector<10x128xf32>
    %c0_6 = arith.constant 0 : index
    %c0_7 = arith.constant 0 : index
    %19 = vector.load %arg4[%c0_6, %c0_7] : memref<10x128xf32, #tpu.memory_space<vmem>>, vector<10x128xf32>
    tpu.vector_store %arg4[%c0_6, %c0_7], %18 {strides = array<i32>} : memref<10x128xf32, #tpu.memory_space<vmem>>, vector<10x128xf32>,
    %20 = tpu.iota {dimensions = array<i32: 1>} : vector<10x128xi32>
    %c128_i32 = arith.constant 128 : i32
    %21 = arith.muli %arg0, %c128_i32 : i32
    %22 = vector.broadcast %21 : i32 to vector<10x128xi32>
    %23 = arith.addi %20, %22 : vector<10x128xi32>
    %c200_i32 = arith.constant 200 : i32
    %24 = vector.broadcast %c200_i32 : i32 to vector<10x128xi32>
    %25 = arith.cmpi slt, %23, %24 : vector<10x128xi32>
    %cst = arith.constant 0.000000e+00 : f32
    %26 = vector.broadcast %cst : f32 to vector<10x128xf32>
    %27 = arith.select %25, %18, %26 : vector<10x128xi1>, vector<10x128xf32>
    %c0_8 = arith.constant 0 : index
    %c0_9 = arith.constant 0 : index
    %28 = vector.load %arg5[%c0_8, %c0_9] : memref<10x1xf32, #tpu.memory_space<vmem>>, vector<10x1xf32>
    %cst_10 = arith.constant dense<0.000000e+00> : vector<10xf32>
    %29 = vector.multi_reduction <add>, %27, %cst_10 [1] : vector<10x128xf32> to vector<10xf32>
    %30 = vector.shape_cast %29 : vector<10xf32> to vector<10x1xf32>
    %31 = arith.addf %28, %30 : vector<10x1xf32>
    %c0_11 = arith.constant 0 : index
    %c0_12 = arith.constant 0 : index
    %32 = vector.load %arg5[%c0_11, %c0_12] : memref<10x1xf32, #tpu.memory_space<vmem>>, vector<10x1xf32>
    tpu.vector_store %arg5[%c0_11, %c0_12], %31 {strides = array<i32>} : memref<10x1xf32, #tpu.memory_space<vmem>>, vector<10x1xf32>,
    %c0_13 = arith.constant 0 : index
    %c0_14 = arith.constant 0 : index
    %33 = vector.load %arg6[%c0_13, %c0_14] : memref<10x1xf32, #tpu.memory_space<vmem>>, vector<10x1xf32>
    %34 = arith.mulf %27, %27 : vector<10x128xf32>
    %cst_15 = arith.constant dense<0.000000e+00> : vector<10xf32>
    %35 = vector.multi_reduction <add>, %34, %cst_15 [1] : vector<10x128xf32> to vector<10xf32>
    %36 = vector.shape_cast %35 : vector<10xf32> to vector<10x1xf32>
    %37 = arith.addf %33, %36 : vector<10x1xf32>
    %c0_16 = arith.constant 0 : index
    %c0_17 = arith.constant 0 : index
    %38 = vector.load %arg6[%c0_16, %c0_17] : memref<10x1xf32, #tpu.memory_space<vmem>>, vector<10x1xf32>
    tpu.vector_store %arg6[%c0_16, %c0_17], %37 {strides = array<i32>} : memref<10x1xf32, #tpu.memory_space<vmem>>, vector<10x1xf32>,
    return
  }
  func.func @transform_0(%arg0: i32) -> (i32, i32) {
    %c0_i32 = arith.constant 0 : i32
    %c0_i32_0 = arith.constant 0 : i32
    return %c0_i32, %arg0 : i32, i32
  }
  func.func @transform_1(%arg0: i32) -> (i32, i32) {
    %c0_i32 = arith.constant 0 : i32
    %c0_i32_0 = arith.constant 0 : i32
    %c0_i32_1 = arith.constant 0 : i32
    return %c0_i32, %c0_i32_0 : i32, i32
  }
  func.func @transform_2(%arg0: i32) -> (i32, i32) {
    %c0_i32 = arith.constant 0 : i32
    %c0_i32_0 = arith.constant 0 : i32
    %c0_i32_1 = arith.constant 0 : i32
    return %c0_i32, %c0_i32_0 : i32, i32
  }
  func.func @transform_3(%arg0: i32) -> (i32, i32) {
    %c0_i32 = arith.constant 0 : i32
    %c0_i32_0 = arith.constant 0 : i32
    return %c0_i32, %arg0 : i32, i32
  }
  func.func @transform_4(%arg0: i32) -> (i32, i32) {
    %c0_i32 = arith.constant 0 : i32
    %c0_i32_0 = arith.constant 0 : i32
    %c0_i32_1 = arith.constant 0 : i32
    return %c0_i32, %c0_i32_0 : i32, i32
  }
  func.func @transform_5(%arg0: i32) -> (i32, i32) {
    %c0_i32 = arith.constant 0 : i32
    %c0_i32_0 = arith.constant 0 : i32
    %c0_i32_1 = arith.constant 0 : i32
    return %c0_i32, %c0_i32_0 : i32, i32
  }
}

</mosaic_0001>

<bundles_post_ra>
// kernel: tpu_custom_call.1
= control target key start
LH: loop header
LB: loop body
LE: loop exit
PB: predicated region body
PF: predicated region fallthrough
CT: control target
= control target key end

     0   :  { %11 = vsyncpa [#allocation3], 0  ;;  %s706_s0 = inlined_call_operand.vmem [shape: f32[2,256], index: 0, kind: input, shape index: {}]   ;;  %s707_s1 = inlined_call_operand.vmem [shape: f32[10,2], index: 1, kind: input, shape index: {}]   ;;  %s708_s2 = inlined_call_operand.vmem [shape: f32[10,1], index: 2, kind: input, shape index: {}]   ;;  %s709_s3 = inlined_call_operand.hbm [shape: f32[10,256], index: 3, kind: output, shape index: {0}]   ;;  %s710_s4 = inlined_call_operand.vmem [shape: f32[10,1], index: 4, kind: output, shape index: {1}]   ;;  %s711_s5 = inlined_call_operand.vmem [shape: f32[10,1], index: 5, kind: output, shape index: {2}]  }
   0x1   :  { %13 = vsyncpa [#allocation3 + $0x1], 0  ;;  %s557_s18 = smov 0   ;;  %s559_s19 = smov 0  }
   0x2   :  { %s561_s20 = smov 0   ;;  %s563_s21 = smov 0  }
   0x3 LB: > { %s578_s22 = sadd.s32 4294967295, %s519_s21   ;;  %s394_s23 = sadd.s32 4294967294, %s519_s21   ;;  %s519_s21 = sphi %s563_s21, %s717_s21   ;;  %s515_s20 = sphi %s561_s20, %s716_s20   ;;  %s511_s19 = sphi %s559_s19, %s715_s19   ;;  %s507_s18 = sphi %s557_s18, %s714_s18  }
   0x4   : > { %s582_s24 = sadd.s32 1, %s519_s21   ;;  %s94_s25 = sadd.s32 1, %s515_s20 }
   0x5   : > { %s91_s26 = ssub.s32 %s519_s21, %s582_s24  ;;  %p104_p0 = scmp.ne.s32.totalorder %s515_s20, %s511_s19 }
   0x6   : > { %p92_p1 = scmp.eq.s32.totalorder %s91_s26, 0  ;;  %p105_p2 = scmp.eq.s32.totalorder %s578_s22, 1 }
   0x7   : > { %p110_p3 = scmp.ne.s32.totalorder %s511_s19, %s507_s18  ;;  %p111_p4 = scmp.eq.s32.totalorder %s394_s23, 1 }
   0x8   : > { %s593_s27 = scalar_select %p92_p1, %s515_s20, %s94_s25  }
   0x9   : > { %p595_p5 = por %p105_p2, %p104_p0  ;;  %p599_p6 = por %p111_p4, %p110_p3 }
   0xa   : > { %p397_p7 = scmp.ge.s32.totalorder %s519_s21, 1  ;;  %p184_p8 = scmp.lt.s32.totalorder %s519_s21, 3 }
   0xc   : > { %p185_p9 = pnand %p397_p7, %p184_p8 }
   0xd   : > { %s204_s30 = sand.u32 (!%p185_p9), 1, %s511_s19   ;;  %p211_p10 = scmp.lt.s32.totalorder (!%p185_p9), %s578_s22, 1 }
   0xe   : > { %188 = sbr.rel (%p185_p9) target bundleno = 291 (0x123), region = 32  ;;  %s398_s6 = sshll.u32 (!%p185_p9), %s204_s30, 4 }
   0xf   : > { %s615_s12 = scalar_lea.vmem (!%p185_p9), [#allocation2], %s398_s6  ;;  %p400_p11 = scmp.ne.s32.totalorder (!%p185_p9), %s578_s22, 0 }
  0x13   : > { %s212_s7 = scalar_select %p211_p10, %s578_s22, 1 }
  0x14   : > { %218 = sbr.rel (%p400_p11) target bundleno = 30 (0x1e), region = 36 }
  0x15   : > { %s399_s8 = sshll.u32 %s212_s7, 1 }
  0x16   : > { %s613_s11 = scalar_lea.vmem %s706_s0, %s399_s8 }
  0x19   : > { %vm219_vm0 = vcmask 7168   ;;  %vm221_vm1 = vcmask 1024   ;;  %v521_v0 = vmov 0.0  }
  0x1a   : > { %220 = vst.msk [vmem:[%s710_s4] sm:$0xff] %vm219_vm0, %v521_v0 }
  0x1b   : > { %223 = vst.msk [vmem:[%s711_s5] sm:$0xff] %vm219_vm0, %v521_v0 }
  0x1c   : > { %222 = vst.msk [vmem:[%s710_s4 + $0x8] sm:$0x3] %vm221_vm1, %v521_v0 }
  0x1d   : > { %224 = vst.msk [vmem:[%s711_s5 + $0x8] sm:$0x3] %vm221_vm1, %v521_v0 }
  0x1e PF: > { %v227_v1 = vld [vmem:[%s707_s1 + $0x8] sm:$0x3]  ;;  %v226_v2 = vld [vmem:[%s707_s1] sm:$0xff]  ;;  %v522_v3 = vmov 0   ;;  %v523_v6 = vmov 1   ;;  %v270_v10 = vlaneseq  ;;  %s401_s16 = sshll.u32 %s578_s22, 7 }
  0x1f   : > { %453 = vset.pattern.permute.xlu1 %v522_v3  ;;  %451 = vset.pattern.permute.xlu0 %v522_v3  ;;  %v255_v4 = vld [vmem:[%s708_s2 + $0x8] sm:$0x3]  ;;  %v254_v5 = vld [vmem:[%s708_s2] sm:$0xff]  ;;  %v273_v15 = vstv %s401_s16  ;;  %vm282_vm3 = vcmask 1041408   ;;  %s317_s26 = sshll.u32 %s615_s12, 4  ;;  %s477_s13 = scalar_lea.hbm %s709_s3, 32  ;;  %s318_s26 = int_to_ptr.vmem [resolvable:$true] %s317_s26 }
  0x20   : > { %235 = vperm.xlu0 %451, %v227_v1   ;;  %230 = vperm.xlu1 %453, %v226_v2   ;;  %v225_v11 = vld [vmem:[%s613_s11] sm:$0x3]  ;;  %v271_v12 = vand.u32 127, %v270_v10  ;;  %s403_s11 = sshll.u32 %s578_s22, 3  ;;  %s306_s22 = scalar_lea.sflag [#allocation3], %s204_s30 }
  0x21   : > { %455 = vset.pattern.permute.xlu2 %v522_v3  ;;  %v238_v13 = vperm.slane %v225_v11, 0  ;;  %v249_v14 = vperm.slane %v225_v11, 1  ;;  %s316_s25 = scalar_lea.hbm %s709_s3, %s403_s11 }
  0x22   : > { %263 = vperm.xlu2 %455, %v255_v4   ;;  %v274_v18 = vadd.s32 %v273_v15, %v271_v12  ;;  %s319_s6 = sshll.u32 %s316_s25, 4  ;;  %s320_s6 = int_to_ptr.hbm [resolvable:$true] %s319_s6 }
  0x23   : > { %s471_s7 = sshra.s32 %s320_s6, 4  ;;  %s472_s7 = int_to_ptr.hbm [resolvable:$true] %s471_s7 }
  0x24   : > { %vm275_vm2 = vcmp.lt.s32.totalorder %v274_v18, 200  ;;  %s473_s8 = scalar_lea.hbm %s472_s7, 16  ;;  %p478_p1 = scmp.lt.s32.totalorder %s472_s7, %s709_s3 }
  0x25   : > { %p474_p12 = scmp.ne.s32.totalorder %s472_s7, %s473_s8  ;;  %p479_p2 = scmp.lt.s32.totalorder %s477_s13, %s473_s8 }
  0x27   : > { %p475_p13 = pnand %p474_p12, %p595_p5  ;;  %p480_p3 = por %p479_p2, %p478_p1 }
  0x28   : > { %452 = vset.pattern.permute.xlu0 %v523_v6  ;;  %454 = vset.pattern.permute.xlu1 %v523_v6 }
  0x29   : > { %246 = vperm.xlu0 %452, %v227_v1   ;;  %242 = vperm.xlu1 %454, %v226_v2   ;;  %p476_p0 = pneg %p475_p13 }
  0x2a   : > { %258 = vperm.xlu2 %455, %v254_v5  }
  0x2b   : > { %p481_p4 = pnand %p480_p3, %p476_p0 }
  0x31   : > { %456 = vset.pattern.permute.xlu0 %v522_v3 }
  0x7c   : > { %v264_v9 = vpop.permute.xlu2 %263 }
  0x84   : > { %v259_v23 = vpop.permute.xlu2 %258 }
  0x92   : > { %v236_v7 = vpop.permute.xlu0 %235  ;;  %v231_v8 = vpop.permute.xlu1 %230 }
  0x93   : > { %v240_v19 = vmul.f32 %v238_v13, %v236_v7  ;;  %v239_v20 = vmul.f32 %v238_v13, %v231_v8 }
  0x9b   : > { %v247_v16 = vpop.permute.xlu0 %246  ;;  %v243_v17 = vpop.permute.xlu1 %242 }
  0x9c   : > { %v251_v21 = vmul.f32 %v249_v14, %v247_v16  ;;  %v250_v22 = vmul.f32 %v249_v14, %v243_v17 }
  0x9e   : > { %v253_v24 = vadd.f32 %v251_v21, %v240_v19  ;;  %v252_v25 = vadd.f32 %v250_v22, %v239_v20 }
  0xa0   : > { %v266_v26 = vadd.f32 %v259_v23, %v252_v25  ;;  %v267_v27 = vadd.f32 %v264_v9, %v253_v24 }
  0xa2   : > { %268 = vst [vmem:[%s615_s12] sm:$0xff] %v266_v26  ;;  %v276_v28 = vsel %vm275_vm2, %v266_v26, 0.0  ;;  %v277_v29 = vsel %vm275_vm2, %v267_v27, 0.0 }
  0xa3   : > { %280 = vadd.xlane.f32.xlu1 %v276_v28  ;;  %v283_v30 = vsel %vm282_vm3, %v277_v29, 0.0  ;;  %269 = vst [vmem:[%s615_s12 + $0x8] sm:$0x3] %v267_v27  ;;  %v294_v31 = vmul.f32 %v276_v28, %v276_v28 }
  0xa4   : > { %284 = vadd.xlane.f32.xlu2 %v283_v30 }
  0xa5   : > { %296 = vadd.xlane.f32.xlu0 %v294_v31 }
  0xa6   : > { %484 = shalt.err (!%p481_p4)
}
  0xa7   : > { %s524_s30 = smov 128   ;;  %s525_s12 = smov 256   ;;  %v295_v32 = vmul.f32 %v277_v29, %v277_v29  ;;  %v278_v34 = vld [vmem:[%s710_s4] sm:$0xff]  ;;  %v279_v35 = vld [vmem:[%s710_s4 + $0x8] sm:$0x3]  ;;  %vm288_vm4 = vcmask 7168  }
  0xa8   : > { %s526_s16 = smov 8   ;;  %v292_v37 = vld [vmem:[%s711_s5] sm:$0xff]  ;;  %vm290_vm5 = vcmask 1024   ;;  %v293_v43 = vld [vmem:[%s711_s5 + $0x8] sm:$0x3] }
  0xa9   : > { %406 = dma.vmem_to_hbm [thread:$0]  (%p595_p5), %s318_s26, 256, %s320_s6, %s306_s22, %s524_s30, %s525_s12, %s526_s16   ;;  %v298_v33 = vsel %vm282_vm3, %v295_v32, 0.0 }
  0xac   : > { %299 = vadd.xlane.f32.xlu2 %v298_v33 }
 0x116   : > { %v281_v36 = vpop.xlane.xlu1 %280 }
 0x117   : > { %v286_v38 = vadd.f32 %v281_v36, %v278_v34  ;;  %v285_v39 = vpop.xlane.xlu2 %284 }
 0x118   : > { %v287_v40 = vadd.f32 %v285_v39, %v279_v35  ;;  %v297_v41 = vpop.xlane.xlu0 %296 }
 0x119   : > { %289 = vst.msk [vmem:[%s710_s4] sm:$0xff] %vm288_vm4, %v286_v38  ;;  %v301_v42 = vadd.f32 %v297_v41, %v292_v37 }
 0x11a   : > { %291 = vst.msk [vmem:[%s710_s4 + $0x8] sm:$0x3] %vm290_vm5, %v287_v40 }
 0x11b   : > { %303 = vst.msk [vmem:[%s711_s5] sm:$0xff] %vm288_vm4, %v301_v42 }
 0x11f   : > { %v300_v44 = vpop.xlane.xlu2 %299 }
 0x120   : > { %v302_v45 = vadd.f32 %v300_v44, %v293_v43 }
 0x122   : > { %304 = vst.msk [vmem:[%s711_s5 + $0x8] sm:$0x3] %vm290_vm5, %v302_v45 }
 0x123 PF: > { %p412_p5 = scmp.ge.s32.totalorder %s519_s21, 2  ;;  %s346_s12 = sand.u32 1, %s507_s18  }
 0x124   : > { %s347_s16 = scalar_lea.sflag [#allocation3], %s346_s12 }
 0x125   : > { %p409_p7 = pnand %p412_p5, %p599_p6 }
 0x127   : > { %p410_p8 = pneg %p409_p7 }
 0x129   : > { %502 = dma.done.wait (%p410_p8), %s347_s16, 256  }
 0x12a   : > { %504 = vsyncadd (%p410_p8), %s347_s16, 4294967040  ;;  %p16_p9 = scmp.ge.s32.totalorder %s582_s24, 4   ;;  %s714_s18 = smov %s511_s19 }
 0x12b   : > { %s715_s19 = smov %s515_s20  ;;  %s716_s20 = smov %s593_s27 }
 0x12c   : > { %s717_s21 = smov %s582_s24  ;;  %18 = sbr.rel (!%p16_p9) target bundleno = 3 (0x3), region = 87 }
 0x131   :  { %353 = vsyncpa [#allocation3], 1 }
 0x132   :  { %355 = vsyncpa [#allocation3 + $0x1], 1 }

</bundles_post_ra>
